<compile_context>
chip_gen: v7x
topology: tpu7x:2x2x1
jax: 0.10.0
libtpu: 0.0.40
codegen_flags: <defaults>
</compile_context>

<pallas_src>
import jax
import jax.numpy as jnp
from jax.experimental import pallas as pl
from jax.experimental.pallas import tpu as pltpu

# ---- problem sizes (small, consistent with the module) ----------------------
N_NODES = 16          # number of graph nodes
IN_CH = 8             # in_channels  (features of x)
HIDDEN_CH = 8         # hidden_channels (features of x_initial)
OUT_CH = 4            # out_channels per head
HEADS = 4             # attention heads
HC = HEADS * OUT_CH   # 16
NHC = N_NODES * HC    # 256 lanes in the packed layout
NROW = N_NODES * (IN_CH + HIDDEN_CH)   # 256 (flattened [x | x_initial] length)
NEG_SLOPE = 0.2       # GATv2Conv default negative_slope
LN_EPS = 1e-5         # torch.nn.LayerNorm default eps
BETA_INIT = 0.8
MASK_VAL = -1e9       # additive mask for non-edges (safe: self-loops + e_max subtract)

# ---- packed parameter layouts ------------------------------------------------
# small pack: [SP_ROWS, NHC] f32
ROW_WL = 0                    # rows 0:IN_CH  -> w_l tiled over targets  [IN_CH, NHC]
ROW_BL = IN_CH                # b_l tiled
ROW_BR = IN_CH + 1            # b_r tiled
ROW_BIAS = IN_CH + 2          # gat_bias + beta*b_res, tiled
ROW_LN_G = IN_CH + 3          # LayerNorm gamma, tiled
ROW_LN_B = IN_CH + 4          # LayerNorm beta, tiled
SP_ROWS = 16

# big pack: [BP_ROWS, 4*NHC] f32
COL_WROW = 0                  # cols 0:2*NHC   -> [I (x) w_r | beta * I (x) w_res]
COL_KR = 2 * NHC              # cols 2N:3N     -> I_N (x) R (att folded in)
COL_ALN = 3 * NHC             # cols 3N:4N     -> I_N (x) (1/HC) grouped-mean operator
BP_ROWS = max(NROW, NHC)      # 256


def _gat_layer_kernel(x_ref, xrow_ref, mask_ref, sp_ref, bp_ref, out_ref):
    x = x_ref[...]                                     # [N, IN_CH]
    xrow = xrow_ref[...]                               # [1, NROW]    (= [x | x_initial] flattened)
    mask2 = mask_ref[...]                              # [N, NHC]     lane-packed additive mask

    # ---- packed parameters (static ref slices) -------------------------------
    w_l_t = sp_ref[ROW_WL:ROW_WL + IN_CH, :]           # [IN_CH, NHC]
    bl_row = sp_ref[ROW_BL:ROW_BL + 1, :]              # [1, NHC]
    br_row = sp_ref[ROW_BR:ROW_BR + 1, :]
    bias_row = sp_ref[ROW_BIAS:ROW_BIAS + 1, :]
    gamma_row = sp_ref[ROW_LN_G:ROW_LN_G + 1, :]
    lnb_row = sp_ref[ROW_LN_B:ROW_LN_B + 1, :]

    w_row = bp_ref[0:NROW, COL_WROW:COL_WROW + 2 * NHC]  # [NROW, 2*NHC]
    kr = bp_ref[0:NHC, COL_KR:COL_KR + NHC]              # [NHC, NHC]
    a_ln = bp_ref[0:NHC, COL_ALN:COL_ALN + NHC]          # [NHC, NHC]

    # ---- (1) source-side projection, tiled across all targets (MXU #1) -------
    # xl_t[j, i*HC+k] = xl[j, k]   (256-lane output, one launch)
    xl_t = jnp.dot(x, w_l_t, preferred_element_type=jnp.float32) + bl_row      # [N, NHC]

    # ---- (2) target-side + residual projections, fused (MXU #2) --------------
    # rows[0, i*HC+k]       = xr[i, k]           (after br_row add)
    # rows[0, NHC+i*HC+k]   = beta * res[i, k]   (beta folded at pack time)
    rows = jnp.dot(xrow, w_row, preferred_element_type=jnp.float32)            # [1, 2*NHC]
    xr_row = rows[:, 0:NHC] + br_row
    res_row = rows[:, NHC:2 * NHC]

    # ---- (3) GATv2 attention logits, lane-packed (MXU #3) ---------------------
    m2 = xl_t + xr_row                                   # broadcast over sublanes
    m2 = jnp.where(m2 > 0, m2, NEG_SLOPE * m2)           # leaky_relu(0.2)
    # per-head <att, .> reduce-and-replicate == block-diagonal matmul (I_N (x) R)
    e2 = jnp.dot(m2, kr, preferred_element_type=jnp.float32) + mask2           # [N, NHC]

    # ---- masked softmax over neighbours j (sublane axis), normalization deferred
    e_max = jnp.max(e2, axis=0, keepdims=True)           # [1, NHC]
    p2 = jnp.exp(e2 - e_max)                             # masked entries underflow to 0
    denom = jnp.sum(p2, axis=0, keepdims=True)           # [1, NHC]
    gat_un = jnp.sum(p2 * xl_t, axis=0, keepdims=True)   # unnormalized aggregation [1, NHC]
    y = gat_un * pl.reciprocal(denom, approx=True) + res_row + bias_row

    # ---- LayerNorm over each node's HC lanes (grouped mean via MXU #4) --------
    stats = jnp.dot(jnp.concatenate([y, y * y], axis=0), a_ln,
                    preferred_element_type=jnp.float32)  # [2, NHC]: E[y], E[y^2] per node
    mean = stats[0:1, :]
    var = stats[1:2, :] - mean * mean
    yn = (y - mean) * jax.lax.rsqrt(var + LN_EPS) * gamma_row + lnb_row

    # ---- GELU (tanh form; EUP) -------------------------------------------------
    # TODO(synk): tanh-form GELU vs nn.GELU's exact erf (|err| ~1e-3).
    inner = jnp.float32(0.7978845608028654) * (yn + 0.044715 * (yn * yn * yn))
    out_ref[...] = 0.5 * yn * (1.0 + jnp.tanh(inner))


def pack_params(p):
    """One-time parameter packing (run when params change, NOT per forward call)."""
    n = N_NODES
    eye_n = jnp.eye(n, dtype=jnp.float32)

    # small pack [SP_ROWS, NHC]
    sp = jnp.zeros((SP_ROWS, NHC), jnp.float32)
    sp = sp.at[ROW_WL:ROW_WL + IN_CH, :].set(jnp.tile(p["w_l"], (1, n)))
    sp = sp.at[ROW_BL, :].set(jnp.tile(p["b_l"].reshape(-1), n))
    sp = sp.at[ROW_BR, :].set(jnp.tile(p["b_r"].reshape(-1), n))
    comb_bias = p["gat_bias"].reshape(-1) + p["beta"][0] * p["b_res"].reshape(-1)
    sp = sp.at[ROW_BIAS, :].set(jnp.tile(comb_bias, n))
    sp = sp.at[ROW_LN_G, :].set(jnp.tile(p["ln_gamma"].reshape(-1), n))
    sp = sp.at[ROW_LN_B, :].set(jnp.tile(p["ln_beta"].reshape(-1), n))

    # big pack [BP_ROWS, 4*NHC]
    bp = jnp.zeros((BP_ROWS, 4 * NHC), jnp.float32)
    # [I (x) w_r | beta * I (x) w_res] acting on the flattened [x | x_initial] row
    bp = bp.at[0:n * IN_CH, COL_WROW:COL_WROW + NHC].set(jnp.kron(eye_n, p["w_r"]))
    bp = bp.at[n * IN_CH:NROW, COL_WROW + NHC:COL_WROW + 2 * NHC].set(
        p["beta"][0] * jnp.kron(eye_n, p["w_res"]))
    # head-replication matrix with att folded in:
    #   R[a, b] = att_flat[a] if a//OUT_CH == b//OUT_CH else 0
    att_flat = p["att"].reshape(HC)                       # head-major
    head_of = jnp.arange(HC) // OUT_CH
    r_mat = jnp.where(head_of[:, None] == head_of[None, :],
                      att_flat[:, None], 0.0).astype(jnp.float32)
    bp = bp.at[0:NHC, COL_KR:COL_KR + NHC].set(jnp.kron(eye_n, r_mat))
    # grouped-mean operator for LayerNorm: I_N (x) (ones(HC,HC)/HC)
    bp = bp.at[0:NHC, COL_ALN:COL_ALN + NHC].set(
        jnp.kron(eye_n, jnp.full((HC, HC), 1.0 / HC, jnp.float32)))
    return {"small": sp, "big": bp}


def build_edge_mask(edge_index, n):
    """One-time per-graph: dense adjacency (add_self_loops=True) -> lane-packed
    additive softmax mask mask2[j, i*HC + k] = 0 if edge j->i else -1e9."""
    src, dst = edge_index[0], edge_index[1]
    adj = jnp.zeros((n, n), jnp.float32).at[dst, src].set(1.0)
    adj = adj.at[jnp.arange(n), jnp.arange(n)].set(1.0)
    mask = jnp.where(adj > 0, 0.0, MASK_VAL).astype(jnp.float32)   # [i, j]
    return jnp.repeat(mask.T, HC, axis=1)                          # [n, n*HC]


def initial_residual_gat_layer(x, x_initial, mask2, packed):
    """Forward pass. `mask2` and `packed` come from build_edge_mask / pack_params
    (hoisted out of the per-call path)."""
    n = x.shape[0]
    assert n == N_NODES and x.shape[1] == IN_CH and x_initial.shape[1] == HIDDEN_CH
    # flattened [x | x_initial] row (lane-dense [1, NROW] input)
    xrow = jnp.concatenate([x.reshape(1, n * IN_CH),
                            x_initial.reshape(1, n * HIDDEN_CH)], axis=1)

    vmem = pl.BlockSpec(memory_space=pltpu.MemorySpace.VMEM)
    out_row = pl.pallas_call(
        _gat_layer_kernel,
        out_shape=jax.ShapeDtypeStruct((1, n * HC), jnp.float32),   # lane-dense output
        in_specs=[vmem, vmem, vmem, vmem, vmem],
        out_specs=vmem,
    )(x, xrow, mask2, packed["small"], packed["big"])
    return out_row.reshape(n, HC)


def _init_params(key):
    ks = jax.random.split(key, 8)
    scale = 0.2
    return {
        # weights stored pre-transposed: [F_in, F_out]
        "w_l": scale * jax.random.normal(ks[0], (IN_CH, HC), jnp.float32),
        "b_l": scale * jax.random.normal(ks[1], (1, HC), jnp.float32),
        "w_r": scale * jax.random.normal(ks[2], (IN_CH, HC), jnp.float32),
        "b_r": scale * jax.random.normal(ks[3], (1, HC), jnp.float32),
        "att": scale * jax.random.normal(ks[4], (HEADS, OUT_CH), jnp.float32),
        "gat_bias": scale * jax.random.normal(ks[5], (1, HC), jnp.float32),
        "w_res": scale * jax.random.normal(ks[6], (HIDDEN_CH, HC), jnp.float32),
        "b_res": scale * jax.random.normal(ks[7], (1, HC), jnp.float32),
        "beta": jnp.array([BETA_INIT], jnp.float32),
        "ln_gamma": jnp.ones((1, HC), jnp.float32),
        "ln_beta": jnp.zeros((1, HC), jnp.float32),
    }


def _reference(x, xi, edge_index, p):
    """Pure-JAX reference mirroring PyG GATv2Conv (eval) + residual/LN/GELU."""
    from jax.scipy.special import erf
    n = x.shape[0]
    src, dst = edge_index[0], edge_index[1]
    adj = jnp.zeros((n, n), jnp.float32).at[dst, src].set(1.0)
    adj = adj.at[jnp.arange(n), jnp.arange(n)].set(1.0)

    xl = (x @ p["w_l"] + p["b_l"]).reshape(n, HEADS, OUT_CH)
    xr = (x @ p["w_r"] + p["b_r"]).reshape(n, HEADS, OUT_CH)
    m = xr[:, None] + xl[None, :]                       # [Ni, Nj, H, C]
    m = jnp.where(m > 0, m, NEG_SLOPE * m)
    e = (m * p["att"][None, None]).sum(-1)              # [Ni, Nj, H]
    e = jnp.where(adj[..., None] > 0, e, -1e30)
    e = e - e.max(axis=1, keepdims=True)
    pij = jnp.exp(e) * adj[..., None]
    alpha = pij / pij.sum(axis=1, keepdims=True)
    gat = jnp.einsum("ijh,jhc->ihc", alpha, xl).reshape(n, -1) + p["gat_bias"]
    res = xi @ p["w_res"] + p["b_res"]
    y = gat + p["beta"][0] * res
    mean = y.mean(-1, keepdims=True)
    var = ((y - mean) ** 2).mean(-1, keepdims=True)
    yn = (y - mean) / jnp.sqrt(var + LN_EPS) * p["ln_gamma"] + p["ln_beta"]
    return 0.5 * yn * (1.0 + erf(yn / jnp.sqrt(2.0)))


if __name__ == "__main__":
    key = jax.random.PRNGKey(0)
    kx, kxi, kp = jax.random.split(key, 3)

    x = jax.random.normal(kx, (N_NODES, IN_CH), jnp.float32)
    x_initial = jax.random.normal(kxi, (N_NODES, HIDDEN_CH), jnp.float32)

    # deterministic ring graph (both directions), no duplicate edges
    idx = jnp.arange(N_NODES, dtype=jnp.int32)
    src = jnp.concatenate([idx, (idx + 1) % N_NODES])
    dst = jnp.concatenate([(idx + 1) % N_NODES, idx])
    edge_index = jnp.stack([src, dst], axis=0)          # [2, 2N]

    params = _init_params(kp)

    # one-time preparation (hoisted out of the forward path)
    mask2 = build_edge_mask(edge_index, N_NODES)
    packed = pack_params(params)

    out = initial_residual_gat_layer(x, x_initial, mask2, packed)
    out = jax.block_until_ready(out)

    ref = _reference(x, x_initial, edge_index, params)
    assert out.shape == (N_NODES, HC)
    assert jnp.allclose(out, ref, rtol=1e-2, atol=1e-2), "mismatch vs reference"

    print("KERNEL_OK")
</pallas_src>

<mosaic_0001>
module attributes {stable_mosaic.version = 11 : i64} {
  func.func @_gat_layer_kernel(%arg0: memref<16x8xf32, #tpu.memory_space<vmem>>, %arg1: memref<1x256xf32, #tpu.memory_space<vmem>>, %arg2: memref<16x256xf32, #tpu.memory_space<vmem>>, %arg3: memref<16x256xf32, #tpu.memory_space<vmem>>, %arg4: memref<256x1024xf32, #tpu.memory_space<vmem>>, %arg5: memref<1x256xf32, #tpu.memory_space<vmem>>) attributes {dimension_semantics = [], scalar_prefetch = 0 : i64, scratch_operands = 0 : i64, tpu.core_type = #tpu.core_type<tc>} {
    %c0 = arith.constant 0 : index
    %c0_0 = arith.constant 0 : index
    %0 = vector.load %arg0[%c0, %c0_0] : memref<16x8xf32, #tpu.memory_space<vmem>>, vector<16x8xf32>
    %c0_1 = arith.constant 0 : index
    %c0_2 = arith.constant 0 : index
    %1 = vector.load %arg1[%c0_1, %c0_2] : memref<1x256xf32, #tpu.memory_space<vmem>>, vector<1x256xf32>
    %c0_3 = arith.constant 0 : index
    %c0_4 = arith.constant 0 : index
    %2 = vector.load %arg2[%c0_3, %c0_4] : memref<16x256xf32, #tpu.memory_space<vmem>>, vector<16x256xf32>
    %c0_5 = arith.constant 0 : index
    %c0_6 = arith.constant 0 : index
    %3 = vector.load %arg3[%c0_5, %c0_6] : memref<16x256xf32, #tpu.memory_space<vmem>>, vector<8x256xf32>
    %c8 = arith.constant 8 : index
    %c0_7 = arith.constant 0 : index
    %4 = vector.load %arg3[%c8, %c0_7] : memref<16x256xf32, #tpu.memory_space<vmem>>, vector<1x256xf32>
    %c9 = arith.constant 9 : index
    %c0_8 = arith.constant 0 : index
    %5 = vector.load %arg3[%c9, %c0_8] : memref<16x256xf32, #tpu.memory_space<vmem>>, vector<1x256xf32>
    %c10 = arith.constant 10 : index
    %c0_9 = arith.constant 0 : index
    %6 = vector.load %arg3[%c10, %c0_9] : memref<16x256xf32, #tpu.memory_space<vmem>>, vector<1x256xf32>
    %c11 = arith.constant 11 : index
    %c0_10 = arith.constant 0 : index
    %7 = vector.load %arg3[%c11, %c0_10] : memref<16x256xf32, #tpu.memory_space<vmem>>, vector<1x256xf32>
    %c12 = arith.constant 12 : index
    %c0_11 = arith.constant 0 : index
    %8 = vector.load %arg3[%c12, %c0_11] : memref<16x256xf32, #tpu.memory_space<vmem>>, vector<1x256xf32>
    %c0_12 = arith.constant 0 : index
    %c0_13 = arith.constant 0 : index
    %9 = vector.load %arg4[%c0_12, %c0_13] : memref<256x1024xf32, #tpu.memory_space<vmem>>, vector<256x512xf32>
    %c0_14 = arith.constant 0 : index
    %c512 = arith.constant 512 : index
    %10 = vector.load %arg4[%c0_14, %c512] : memref<256x1024xf32, #tpu.memory_space<vmem>>, vector<256x256xf32>
    %c0_15 = arith.constant 0 : index
    %c768 = arith.constant 768 : index
    %11 = vector.load %arg4[%c0_15, %c768] : memref<256x1024xf32, #tpu.memory_space<vmem>>, vector<256x256xf32>
    %cst = arith.constant dense<0.000000e+00> : vector<16x256xf32>
    %12 = tpu.matmul %0, %3, %cst {dimension_numbers = #tpu.dot_dimension_numbers<[1], [0], [0], [1], [0, 0, 1, 1], [], []>} : vector<16x8xf32>, vector<8x256xf32>, vector<16x256xf32> -> vector<16x256xf32>
    %13 = vector.broadcast %4 : vector<1x256xf32> to vector<16x256xf32>
    %14 = arith.addf %12, %13 : vector<16x256xf32>
    %cst_16 = arith.constant dense<0.000000e+00> : vector<1x512xf32>
    %15 = tpu.matmul %1, %9, %cst_16 {dimension_numbers = #tpu.dot_dimension_numbers<[1], [0], [0], [1], [0, 0, 1, 1], [], []>} : vector<1x256xf32>, vector<256x512xf32>, vector<1x512xf32> -> vector<1x512xf32>
    %16 = vector.extract_strided_slice %15 {offsets = [0, 0], sizes = [1, 256], strides = [1, 1]} : vector<1x512xf32> to vector<1x256xf32>
    %17 = arith.addf %16, %5 : vector<1x256xf32>
    %18 = vector.extract_strided_slice %15 {offsets = [0, 256], sizes = [1, 256], strides = [1, 1]} : vector<1x512xf32> to vector<1x256xf32>
    %19 = vector.broadcast %17 : vector<1x256xf32> to vector<16x256xf32>
    %20 = arith.addf %14, %19 : vector<16x256xf32>
    %cst_17 = arith.constant 0.000000e+00 : f32
    %21 = vector.broadcast %cst_17 : f32 to vector<16x256xf32>
    %22 = arith.cmpf ogt, %20, %21 : vector<16x256xf32>
    %cst_18 = arith.constant 2.000000e-01 : f32
    %23 = vector.broadcast %cst_18 : f32 to vector<16x256xf32>
    %24 = arith.mulf %23, %20 : vector<16x256xf32>
    %25 = arith.select %22, %20, %24 : vector<16x256xi1>, vector<16x256xf32>
    %cst_19 = arith.constant dense<0.000000e+00> : vector<16x256xf32>
    %26 = tpu.matmul %25, %10, %cst_19 {dimension_numbers = #tpu.dot_dimension_numbers<[1], [0], [0], [1], [0, 0, 1, 1], [], []>} : vector<16x256xf32>, vector<256x256xf32>, vector<16x256xf32> -> vector<16x256xf32>
    %27 = arith.addf %26, %2 : vector<16x256xf32>
    %cst_20 = arith.constant dense<0xFF800000> : vector<256xf32>
    %28 = vector.multi_reduction <maximumf>, %27, %cst_20 [0] : vector<16x256xf32> to vector<256xf32>
    %29 = vector.shape_cast %28 : vector<256xf32> to vector<1x256xf32>
    %30 = vector.broadcast %29 : vector<1x256xf32> to vector<16x256xf32>
    %31 = arith.subf %27, %30 : vector<16x256xf32>
    %32 = math.exp %31 : vector<16x256xf32>
    %cst_21 = arith.constant dense<0.000000e+00> : vector<256xf32>
    %33 = vector.multi_reduction <add>, %32, %cst_21 [0] : vector<16x256xf32> to vector<256xf32>
    %34 = vector.shape_cast %33 : vector<256xf32> to vector<1x256xf32>
    %35 = arith.mulf %32, %14 : vector<16x256xf32>
    %cst_22 = arith.constant dense<0.000000e+00> : vector<256xf32>
    %36 = vector.multi_reduction <add>, %35, %cst_22 [0] : vector<16x256xf32> to vector<256xf32>
    %37 = vector.shape_cast %36 : vector<256xf32> to vector<1x256xf32>
    %38 = tpu.reciprocal %34 {approx = true} : vector<1x256xf32> -> vector<1x256xf32>
    %39 = arith.mulf %37, %38 : vector<1x256xf32>
    %40 = arith.addf %39, %18 : vector<1x256xf32>
    %41 = arith.addf %40, %6 : vector<1x256xf32>
    %42 = arith.mulf %41, %41 : vector<1x256xf32>
    %43 = tpu.concatenate %41, %42 in 0 : vector<1x256xf32>, vector<1x256xf32> -> vector<2x256xf32>
    %cst_23 = arith.constant dense<0.000000e+00> : vector<2x256xf32>
    %44 = tpu.matmul %43, %11, %cst_23 {dimension_numbers = #tpu.dot_dimension_numbers<[1], [0], [0], [1], [0, 0, 1, 1], [], []>} : vector<2x256xf32>, vector<256x256xf32>, vector<2x256xf32> -> vector<2x256xf32>
    %45 = vector.extract_strided_slice %44 {offsets = [0, 0], sizes = [1, 256], strides = [1, 1]} : vector<2x256xf32> to vector<1x256xf32>
    %46 = vector.extract_strided_slice %44 {offsets = [1, 0], sizes = [1, 256], strides = [1, 1]} : vector<2x256xf32> to vector<1x256xf32>
    %47 = arith.mulf %45, %45 : vector<1x256xf32>
    %48 = arith.subf %46, %47 : vector<1x256xf32>
    %49 = arith.subf %41, %45 : vector<1x256xf32>
    %cst_24 = arith.constant 9.99999974E-6 : f32
    %50 = vector.broadcast %cst_24 : f32 to vector<1x256xf32>
    %51 = arith.addf %48, %50 : vector<1x256xf32>
    %52 = math.rsqrt %51 : vector<1x256xf32>
    %53 = arith.mulf %49, %52 : vector<1x256xf32>
    %54 = arith.mulf %53, %7 : vector<1x256xf32>
    %55 = arith.addf %54, %8 : vector<1x256xf32>
    %56 = arith.mulf %55, %55 : vector<1x256xf32>
    %57 = arith.mulf %56, %55 : vector<1x256xf32>
    %cst_25 = arith.constant 4.471500e-02 : f32
    %58 = vector.broadcast %cst_25 : f32 to vector<1x256xf32>
    %59 = arith.mulf %58, %57 : vector<1x256xf32>
    %60 = arith.addf %55, %59 : vector<1x256xf32>
    %cst_26 = arith.constant 0.797884583 : f32
    %61 = vector.broadcast %cst_26 : f32 to vector<1x256xf32>
    %62 = arith.mulf %61, %60 : vector<1x256xf32>
    %cst_27 = arith.constant 5.000000e-01 : f32
    %63 = vector.broadcast %cst_27 : f32 to vector<1x256xf32>
    %64 = arith.mulf %63, %55 : vector<1x256xf32>
    %65 = math.tanh %62 : vector<1x256xf32>
    %cst_28 = arith.constant 1.000000e+00 : f32
    %66 = vector.broadcast %cst_28 : f32 to vector<1x256xf32>
    %67 = arith.addf %66, %65 : vector<1x256xf32>
    %68 = arith.mulf %64, %67 : vector<1x256xf32>
    %c0_29 = arith.constant 0 : index
    %c0_30 = arith.constant 0 : index
    %69 = vector.load %arg5[%c0_29, %c0_30] : memref<1x256xf32, #tpu.memory_space<vmem>>, vector<1x256xf32>
    tpu.vector_store %arg5[%c0_29, %c0_30], %68 {strides = array<i32>} : memref<1x256xf32, #tpu.memory_space<vmem>>, vector<1x256xf32>,
    return
  }
}

</mosaic_0001>

<bundles_post_ra>
// kernel: tpu_custom_call.1
= control target key start
LH: loop header
LB: loop body
LE: loop exit
PB: predicated region body
PF: predicated region fallthrough
CT: control target
= control target key end

     0   :  { %10 = vsyncpa [#allocation3], 0  ;;  %s1480_s0 = inlined_call_operand.vmem [shape: f32[16,8], index: 0, kind: input, shape index: {}]   ;;  %s1481_s1 = inlined_call_operand.vmem [shape: f32[1,256], index: 1, kind: input, shape index: {}]   ;;  %s1482_s2 = inlined_call_operand.hbm [shape: f32[16,256], index: 2, kind: input, shape index: {}]   ;;  %s1483_s3 = inlined_call_operand.vmem [shape: f32[16,256], index: 3, kind: input, shape index: {}]   ;;  %s1484_s4 = inlined_call_operand.hbm [shape: f32[256,1024], index: 4, kind: input, shape index: {}]   ;;  %s1485_s5 = inlined_call_operand.hbm [shape: f32[1,256], index: 5, kind: output, shape index: {}]  }
   0x1   :  { %11 = vsyncpa [#allocation6], 0 }
   0x2   :  { %12 = vsyncpa [#allocation4], 0  ;;  %s1316_s18 = smov [#allocation2]   ;;  %s1244_s22 = scalar_lea.hbm %s1482_s2, 512 }
   0x3   :  { %s22_s19 = sshll.u32 %s1316_s18, 4  ;;  %p1245_p0 = scmp.ne.s32.totalorder %s1482_s2, %s1244_s22  ;;  %s23_s19 = int_to_ptr.vmem [resolvable:$true] %s22_s19 }
   0x4   :  { %p1248_p1 = scmp.lt.u32.totalorder %s1244_s22, %s1482_s2 }
   0x6   :  { %p1250_p2 = pnand %p1248_p1, %p1245_p0 }
   0x8   :  { %1253 = shalt.err (!%p1250_p2)
}
   0x9   :  { %s1254_s27 = scalar_lea.vmem %s23_s19, 512  ;;  %p1259_p4 = scmp.lt.s32.totalorder %s23_s19, %s23_s19 }
   0xa   :  { %p1255_p3 = scmp.ne.s32.totalorder %s23_s19, %s1254_s27  ;;  %p1260_p5 = scmp.lt.s32.totalorder %s1254_s27, %s1254_s27 }
   0xc   :  { %p1261_p6 = por %p1260_p5, %p1259_p4 }
   0xe   :  { %p1262_p7 = pnand %p1261_p6, %p1255_p3 }
  0x10   :  { %1265 = shalt.err (!%p1262_p7)
}
  0x11   :  { %s1317_s28 = smov 256   ;;  %s1318_s29 = smov 16  }
  0x12   :  { %28 = dma.hbm_to_vmem [thread:$0]  %s1482_s2, 512, %s23_s19, [#allocation3], %s1317_s28, %s1317_s28, %s1318_s29  }
  0x13   :  { %s1319_s7 = smov [#allocation5]   ;;  %s1266_s11 = scalar_lea.hbm %s1484_s4, 32768 }
  0x14   :  { %s36_s8 = sshll.u32 %s1319_s7, 4  ;;  %p1267_p8 = scmp.ne.s32.totalorder %s1484_s4, %s1266_s11  ;;  %s37_s8 = int_to_ptr.vmem [resolvable:$true] %s36_s8 }
  0x15   :  { %p1270_p9 = scmp.lt.u32.totalorder %s1266_s11, %s1484_s4 }
  0x17   :  { %p1272_p10 = pnand %p1270_p9, %p1267_p8 }
  0x19   :  { %1275 = shalt.err (!%p1272_p10)
}
  0x1a   :  { %s1276_s16 = scalar_lea.vmem %s37_s8, 32768  ;;  %p1281_p12 = scmp.lt.s32.totalorder %s37_s8, %s37_s8 }
  0x1b   :  { %p1277_p11 = scmp.ne.s32.totalorder %s37_s8, %s1276_s16  ;;  %p1282_p13 = scmp.lt.s32.totalorder %s1276_s16, %s1276_s16 }
  0x1d   :  { %p1283_p0 = por %p1282_p13, %p1281_p12 }
  0x1f   :  { %p1284_p1 = pnand %p1283_p0, %p1277_p11 }
  0x21   :  { %1287 = shalt.err (!%p1284_p1)
}
  0x22   :  { %s1320_s2 = smov 1024   ;;  %s1321_s17 = smov 64  }
  0x23   :  { %42 = dma.hbm_to_vmem [thread:$0]  %s1484_s4, 32768, %s37_s8, [#allocation6], %s1320_s2, %s1320_s2, %s1321_s17  }
  0x24   :  { %1310 = dma.done.wait [#allocation3], 512  }
  0x25   :  { %1311 = vsyncadd [#allocation3], 4294966784 }
  0x26   :  { %1312 = dma.done.wait [#allocation6], 32768  }
  0x27   :  { %1313 = vsyncadd [#allocation6], 4294934528  ;;  %v1322_v0 = vmov 0.0   ;;  %v69_v1 = vld [vmem:[#allocation5 + $0x8] sm:$0xff]  ;;  %v68_v3 = vld [vmem:[#allocation5] sm:$0xff]  ;;  %v325_v26 = vlaneseq  ;;  %vm335_vm0 = vcmask 64512  }
  0x28   :  { %406 = vmatprep.mubr.f32.mxu0 %v1322_v0  ;;  %v73_v2 = vld [vmem:[#allocation5 + $0x48] sm:$0xff]  ;;  %v72_v5 = vld [vmem:[#allocation5 + $0x40] sm:$0xff]  ;;  %vm771_vm5 = vcmask 1040384  }
  0x29   :  { %v959_v4 = vpack.c.bf16 %v73_v2, %v69_v1  ;;  %v77_v6 = vld [vmem:[#allocation5 + $0x88] sm:$0xff]  ;;  %v961_v8 = vpack.c.bf16 %v72_v5, %v68_v3  ;;  %v76_v10 = vld [vmem:[#allocation5 + $0x80] sm:$0xff]  ;;  %v1381_v33 = vshrl.u32 %v325_v26, 7  ;;  %vm933_vm6 = vcmp.lt.s32.totalorder %v325_v26, 256 }
  0x2a   :  { %v81_v7 = vld [vmem:[#allocation5 + $0xc8] sm:$0xff]  ;;  %v80_v11 = vld [vmem:[#allocation5 + $0xc0] sm:$0xff] }
  0x2b   :  { %v963_v9 = vpack.c.bf16 %v81_v7, %v77_v6  ;;  %v85_v12 = vld [vmem:[#allocation5 + $0x108] sm:$0xff]  ;;  %960 = vmatprep.subr.bf16.mxu1 %v959_v4  ;;  %v965_v14 = vpack.c.bf16 %v80_v11, %v76_v10  ;;  %v84_v16 = vld [vmem:[#allocation5 + $0x100] sm:$0xff]  ;;  %v1384_v40 = vsub.s32 1, %v1381_v33 }
  0x2c   :  { %v89_v13 = vld [vmem:[#allocation5 + $0x148] sm:$0xff]  ;;  %962 = vmatpush1.bf16.msra.mxu1 %v961_v8  ;;  %v88_v17 = vld [vmem:[#allocation5 + $0x140] sm:$0xff] }
  0x2d   :  { %964 = vmatprep.subr.bf16.mxu1 %v963_v9  ;;  %v967_v15 = vpack.c.bf16 %v89_v13, %v85_v12  ;;  %v93_v18 = vld [vmem:[#allocation5 + $0x188] sm:$0xff]  ;;  %v969_v20 = vpack.c.bf16 %v88_v17, %v84_v16  ;;  %v92_v22 = vld [vmem:[#allocation5 + $0x180] sm:$0xff] }
  0x2e   :  { %v97_v19 = vld [vmem:[#allocation5 + $0x1c8] sm:$0xff]  ;;  %v96_v23 = vld [vmem:[#allocation5 + $0x1c0] sm:$0xff] }
  0x2f   :  { %v971_v21 = vpack.c.bf16 %v97_v19, %v93_v18  ;;  %v101_v24 = vld [vmem:[#allocation5 + $0x208] sm:$0xff]  ;;  %v973_v27 = vpack.c.bf16 %v96_v23, %v92_v22  ;;  %v100_v29 = vld [vmem:[#allocation5 + $0x200] sm:$0xff] }
  0x30   :  { %966 = vmatpush1.bf16.msra.mxu1 %v965_v14  ;;  %v105_v25 = vld [vmem:[#allocation5 + $0x248] sm:$0xff]  ;;  %v104_v30 = vld [vmem:[#allocation5 + $0x240] sm:$0xff] }
  0x31   :  { %968 = vmatprep.subr.bf16.mxu1 %v967_v15  ;;  %v975_v28 = vpack.c.bf16 %v105_v25, %v101_v24  ;;  %v109_v31 = vld [vmem:[#allocation5 + $0x288] sm:$0xff]  ;;  %v977_v34 = vpack.c.bf16 %v104_v30, %v100_v29  ;;  %v108_v36 = vld [vmem:[#allocation5 + $0x280] sm:$0xff] }
  0x32   :  { %v113_v32 = vld [vmem:[#allocation5 + $0x2c8] sm:$0xff]  ;;  %v112_v37 = vld [vmem:[#allocation5 + $0x2c0] sm:$0xff] }
  0x33   :  { %v979_v35 = vpack.c.bf16 %v113_v32, %v109_v31  ;;  %v117_v38 = vld [vmem:[#allocation5 + $0x308] sm:$0xff]  ;;  %v981_v41 = vpack.c.bf16 %v112_v37, %v108_v36  ;;  %v116_v42 = vld [vmem:[#allocation5 + $0x300] sm:$0xff] }
  0x34   :  { %970 = vmatpush1.bf16.msra.mxu1 %v969_v20  ;;  %v121_v39 = vld [vmem:[#allocation5 + $0x348] sm:$0xff]  ;;  %v120_v45 = vld [vmem:[#allocation5 + $0x340] sm:$0xff] }
  0x35   :  { %972 = vmatprep.subr.bf16.mxu1 %v971_v21  ;;  %v57_v43 = vld [vmem:[%s1483_s3 + $0x8] sm:$0xff]  ;;  %v983_v44 = vpack.c.bf16 %v121_v39, %v117_v38  ;;  %v56_v47 = vld [vmem:[%s1483_s3] sm:$0xff]  ;;  %v985_v52 = vpack.c.bf16 %v120_v45, %v116_v42 }
  0x36   :  { %v125_v46 = vld [vmem:[#allocation5 + $0x388] sm:$0xff]  ;;  %342 = vmatprep.subr.mxu0 %v57_v43  ;;  %v49_v49 = vld [vmem:[%s1480_s0] sm:$0xff] }
  0x37   :  { %v129_v48 = vld [vmem:[#allocation5 + $0x3c8] sm:$0xff]  ;;  %343 = vmatpush1.msra.mxu0 %v56_v47  ;;  %v1398_v50 = vld [vmem:[%s1481_s1] sm:$0x3] }
  0x38   :  { %974 = vmatpush1.bf16.msra.mxu1 %v973_v27  ;;  %957 = vmatmul.mubr.msk.f32.vlgmr.msra.gmra.mrb[0].mxu0 %vm335_vm0, %v49_v49  ;;  %v427_v51 = vrot.slane %v1398_v50, %v1384_v40  ;;  %v50_v53 = vld [vmem:[%s1480_s0 + $0x8] sm:$0xff]  ;;  %v987_v54 = vpack.c.bf16 %v129_v48, %v125_v46  ;;  %v124_v55 = vld [vmem:[#allocation5 + $0x380] sm:$0xff]  ;;  %v1409_v46 = vsub.s32 0, %v1381_v33 }
  0x39   :  { %976 = vmatprep.subr.bf16.mxu1 %v975_v28  ;;  %412 = vmatprep.mubr.f32.mxu0 %v1322_v0  ;;  %v128_v56 = vld [vmem:[#allocation5 + $0x3c0] sm:$0xff]  ;;  %v133_v57 = vld [vmem:[#allocation5 + $0x408] sm:$0xff] }
  0x3a   :  { %494 = vmatprep.mubr.f32.mxu1 %v427_v51  ;;  %v137_v58 = vld [vmem:[#allocation5 + $0x448] sm:$0xff]  ;;  %v989_v59 = vpack.c.bf16 %v128_v56, %v124_v55  ;;  %v132_v61 = vld [vmem:[#allocation5 + $0x400] sm:$0xff] }
  0x3b   :  { %v991_v60 = vpack.c.bf16 %v137_v58, %v133_v57  ;;  %v136_v62 = vld [vmem:[#allocation5 + $0x440] sm:$0xff]  ;;  %v141_v63 = vld [vmem:[#allocation5 + $0x488] sm:$0xff] }
  0x3c   :  { %978 = vmatpush1.bf16.msra.mxu1 %v977_v34  ;;  %958 = vmatmul.mubr.msk.f32.gmra.mrb[2].mxu0 %vm335_vm0, %v50_v53  ;;  %v145_v0 = vld [vmem:[#allocation5 + $0x4c8] sm:$0xff]  ;;  %v993_v1 = vpack.c.bf16 %v136_v62, %v132_v61  ;;  %v140_v3 = vld [vmem:[#allocation5 + $0x480] sm:$0xff] }
  0x3d   :  { %980 = vmatprep.subr.bf16.mxu1 %v979_v35  ;;  %565 = vmatprep.mubr.f32.mxu0 %v427_v51  ;;  %v995_v2 = vpack.c.bf16 %v145_v0, %v141_v63  ;;  %v144_v4 = vld [vmem:[#allocation5 + $0x4c0] sm:$0xff]  ;;  %v149_v5 = vld [vmem:[#allocation5 + $0x508] sm:$0xff] }
  0x3e   :  { %v153_v6 = vld [vmem:[#allocation5 + $0x548] sm:$0xff]  ;;  %v997_v7 = vpack.c.bf16 %v144_v4, %v140_v3  ;;  %v148_v9 = vld [vmem:[#allocation5 + $0x500] sm:$0xff] }
  0x3f   :  { %v999_v8 = vpack.c.bf16 %v153_v6, %v149_v5  ;;  %v152_v10 = vld [vmem:[#allocation5 + $0x540] sm:$0xff]  ;;  %v157_v11 = vld [vmem:[#allocation5 + $0x588] sm:$0xff] }
  0x40   :  { %982 = vmatpush1.bf16.msra.mxu1 %v981_v41  ;;  %v161_v12 = vld [vmem:[#allocation5 + $0x5c8] sm:$0xff]  ;;  %v1001_v13 = vpack.c.bf16 %v152_v10, %v148_v9  ;;  %v156_v15 = vld [vmem:[#allocation5 + $0x580] sm:$0xff] }
  0x41   :  { %984 = vmatprep.subr.bf16.mxu1 %v983_v44  ;;  %v1003_v14 = vpack.c.bf16 %v161_v12, %v157_v11  ;;  %v160_v16 = vld [vmem:[#allocation5 + $0x5c0] sm:$0xff]  ;;  %v165_v17 = vld [vmem:[#allocation5 + $0x608] sm:$0xff] }
  0x42   :  { %v169_v18 = vld [vmem:[#allocation5 + $0x648] sm:$0xff]  ;;  %v1005_v19 = vpack.c.bf16 %v160_v16, %v156_v15  ;;  %v164_v21 = vld [vmem:[#allocation5 + $0x600] sm:$0xff] }
  0x43   :  { %v1007_v20 = vpack.c.bf16 %v169_v18, %v165_v17  ;;  %v168_v22 = vld [vmem:[#allocation5 + $0x640] sm:$0xff]  ;;  %v173_v23 = vld [vmem:[#allocation5 + $0x688] sm:$0xff] }
  0x44   :  { %986 = vmatpush1.bf16.msra.mxu1 %v985_v52  ;;  %v177_v24 = vld [vmem:[#allocation5 + $0x6c8] sm:$0xff]  ;;  %v1009_v25 = vpack.c.bf16 %v168_v22, %v164_v21  ;;  %v172_v28 = vld [vmem:[#allocation5 + $0x680] sm:$0xff] }
  0x45   :  { %988 = vmatprep.subr.bf16.mxu1 %v987_v54  ;;  %v1011_v27 = vpack.c.bf16 %v177_v24, %v173_v23  ;;  %v176_v29 = vld [vmem:[#allocation5 + $0x6c0] sm:$0xff]  ;;  %v181_v30 = vld [vmem:[#allocation5 + $0x708] sm:$0xff]  ;;  %v1413_v54 = vrot.slane %v1398_v50, %v1409_v46 }
  0x46   :  { %v185_v31 = vld [vmem:[#allocation5 + $0x748] sm:$0xff]  ;;  %v1013_v32 = vpack.c.bf16 %v176_v29, %v172_v28  ;;  %v180_v35 = vld [vmem:[#allocation5 + $0x700] sm:$0xff] }
  0x47   :  { %v1015_v34 = vpack.c.bf16 %v185_v31, %v181_v30  ;;  %v184_v36 = vld [vmem:[#allocation5 + $0x740] sm:$0xff]  ;;  %v189_v37 = vld [vmem:[#allocation5 + $0x788] sm:$0xff] }
  0x48   :  { %990 = vmatpush1.bf16.msra.mxu1 %v989_v59  ;;  %v193_v38 = vld [vmem:[#allocation5 + $0x7c8] sm:$0xff]  ;;  %v1017_v39 = vpack.c.bf16 %v184_v36, %v180_v35  ;;  %v188_v42 = vld [vmem:[#allocation5 + $0x780] sm:$0xff] }
  0x49   :  { %992 = vmatprep.subr.bf16.mxu1 %v991_v60  ;;  %v1019_v41 = vpack.c.bf16 %v193_v38, %v189_v37  ;;  %v192_v43 = vld [vmem:[#allocation5 + $0x7c0] sm:$0xff]  ;;  %v197_v44 = vld [vmem:[#allocation5 + $0x28] sm:$0xff] }
  0x4a   :  { %v199_v45 = vld [vmem:[#allocation5 + $0x68] sm:$0xff]  ;;  %v1021_v47 = vpack.c.bf16 %v192_v43, %v188_v42  ;;  %v196_v49 = vld [vmem:[#allocation5 + $0x20] sm:$0xff] }
  0x4b   :  { %v1087_v48 = vpack.c.bf16 %v199_v45, %v197_v44  ;;  %v198_v51 = vld [vmem:[#allocation5 + $0x60] sm:$0xff]  ;;  %v201_v52 = vld [vmem:[#allocation5 + $0xa8] sm:$0xff] }
  0x4c   :  { %994 = vmatpush1.bf16.msra.mxu1 %v993_v1  ;;  %v203_v53 = vld [vmem:[#allocation5 + $0xe8] sm:$0xff]  ;;  %v1089_v55 = vpack.c.bf16 %v198_v51, %v196_v49  ;;  %v200_v57 = vld [vmem:[#allocation5 + $0xa0] sm:$0xff] }
  0x4d   :  { %996 = vmatprep.subr.bf16.mxu1 %v995_v2  ;;  %v1091_v56 = vpack.c.bf16 %v203_v53, %v201_v52  ;;  %v202_v58 = vld [vmem:[#allocation5 + $0xe0] sm:$0xff]  ;;  %v205_v59 = vld [vmem:[#allocation5 + $0x128] sm:$0xff] }
  0x4e   :  { %v207_v60 = vld [vmem:[#allocation5 + $0x168] sm:$0xff]  ;;  %v1093_v61 = vpack.c.bf16 %v202_v58, %v200_v57  ;;  %v204_v63 = vld [vmem:[#allocation5 + $0x120] sm:$0xff] }
  0x4f   :  { %v1095_v62 = vpack.c.bf16 %v207_v60, %v205_v59  ;;  %v206_v0 = vld [vmem:[#allocation5 + $0x160] sm:$0xff]  ;;  %v209_v1 = vld [vmem:[#allocation5 + $0x1a8] sm:$0xff] }
  0x50   :  { %998 = vmatpush1.bf16.msra.mxu1 %v997_v7  ;;  %v211_v2 = vld [vmem:[#allocation5 + $0x1e8] sm:$0xff]  ;;  %v1097_v50 = vpack.c.bf16 %v206_v0, %v204_v63  ;;  %v208_v4 = vld [vmem:[#allocation5 + $0x1a0] sm:$0xff] }
  0x51   :  { %1000 = vmatprep.subr.bf16.mxu1 %v999_v8  ;;  %v1099_v3 = vpack.c.bf16 %v211_v2, %v209_v1  ;;  %v210_v5 = vld [vmem:[#allocation5 + $0x1e0] sm:$0xff]  ;;  %v213_v6 = vld [vmem:[#allocation5 + $0x228] sm:$0xff] }
  0x52   :  { %v215_v7 = vld [vmem:[#allocation5 + $0x268] sm:$0xff]  ;;  %v1101_v8 = vpack.c.bf16 %v210_v5, %v208_v4  ;;  %v212_v10 = vld [vmem:[#allocation5 + $0x220] sm:$0xff] }
  0x53   :  { %v1103_v9 = vpack.c.bf16 %v215_v7, %v213_v6  ;;  %v214_v11 = vld [vmem:[#allocation5 + $0x260] sm:$0xff]  ;;  %v217_v12 = vld [vmem:[#allocation5 + $0x2a8] sm:$0xff] }
  0x54   :  { %1002 = vmatpush1.bf16.msra.mxu1 %v1001_v13  ;;  %v219_v13 = vld [vmem:[#allocation5 + $0x2e8] sm:$0xff]  ;;  %v216_v16 = vld [vmem:[#allocation5 + $0x2a0] sm:$0xff] }
  0x55   :  { %1004 = vmatprep.subr.bf16.mxu1 %v1003_v14  ;;  %v1105_v14 = vpack.c.bf16 %v214_v11, %v212_v10  ;;  %v1107_v15 = vpack.c.bf16 %v219_v13, %v217_v12  ;;  %v218_v17 = vld [vmem:[#allocation5 + $0x2e0] sm:$0xff]  ;;  %v221_v18 = vld [vmem:[#allocation5 + $0x328] sm:$0xff] }
  0x56   :  { %v220_v22 = vld [vmem:[#allocation5 + $0x320] sm:$0xff]  ;;  %v225_v24 = vld [vmem:[#allocation5 + $0x3a8] sm:$0xff] }
  0x57   :  { %v222_v23 = vld [vmem:[#allocation5 + $0x360] sm:$0xff]  ;;  %v229_v31 = vld [vmem:[#allocation5 + $0x428] sm:$0xff] }
  0x58   :  { %1006 = vmatpush1.bf16.msra.mxu1 %v1005_v19  ;;  %v223_v19 = vld [vmem:[#allocation5 + $0x368] sm:$0xff]  ;;  %v224_v29 = vld [vmem:[#allocation5 + $0x3a0] sm:$0xff] }
  0x59   :  { %1008 = vmatprep.subr.bf16.mxu1 %v1007_v20  ;;  %v1109_v20 = vpack.c.bf16 %v218_v17, %v216_v16  ;;  %v1111_v21 = vpack.c.bf16 %v223_v19, %v221_v18  ;;  %v226_v30 = vld [vmem:[#allocation5 + $0x3e0] sm:$0xff]  ;;  %v233_v38 = vld [vmem:[#allocation5 + $0x4a8] sm:$0xff]  ;;  %v71_v17 = vld [vmem:[#allocation5 + $0x18] sm:$0xff] }
  0x5a   :  { %v228_v36 = vld [vmem:[#allocation5 + $0x420] sm:$0xff]  ;;  %v237_v45 = vld [vmem:[#allocation5 + $0x528] sm:$0xff]  ;;  %v75_v18 = vld [vmem:[#allocation5 + $0x58] sm:$0xff] }
  0x5b   :  { %v230_v37 = vld [vmem:[#allocation5 + $0x460] sm:$0xff]  ;;  %v241_v53 = vld [vmem:[#allocation5 + $0x5a8] sm:$0xff] }
  0x5c   :  { %1010 = vmatpush1.bf16.msra.mxu1 %v1009_v25  ;;  %v227_v25 = vld [vmem:[#allocation5 + $0x3e8] sm:$0xff]  ;;  %v232_v43 = vld [vmem:[#allocation5 + $0x4a0] sm:$0xff] }
  0x5d   :  { %1012 = vmatprep.subr.bf16.mxu1 %v1011_v27  ;;  %v1113_v27 = vpack.c.bf16 %v222_v23, %v220_v22  ;;  %v1115_v28 = vpack.c.bf16 %v227_v25, %v225_v24  ;;  %v234_v44 = vld [vmem:[#allocation5 + $0x4e0] sm:$0xff]  ;;  %v245_v60 = vld [vmem:[#allocation5 + $0x628] sm:$0xff]  ;;  %v70_v22 = vld [vmem:[#allocation5 + $0x10] sm:$0xff] }
  0x5e   :  { %v236_v51 = vld [vmem:[#allocation5 + $0x520] sm:$0xff]  ;;  %v74_v23 = vld [vmem:[#allocation5 + $0x50] sm:$0xff] }
  0x5f   :  { %v238_v52 = vld [vmem:[#allocation5 + $0x560] sm:$0xff]  ;;  %v1025_v25 = vpack.c.bf16 %v74_v23, %v70_v22 }
  0x60   :  { %1014 = vmatpush1.bf16.msra.mxu1 %v1013_v32  ;;  %v231_v32 = vld [vmem:[#allocation5 + $0x468] sm:$0xff]  ;;  %v240_v58 = vld [vmem:[#allocation5 + $0x5a0] sm:$0xff] }
  0x61   :  { %1016 = vmatprep.subr.bf16.mxu1 %v1015_v34  ;;  %v1117_v34 = vpack.c.bf16 %v226_v30, %v224_v29  ;;  %v1119_v35 = vpack.c.bf16 %v231_v32, %v229_v31  ;;  %v242_v59 = vld [vmem:[#allocation5 + $0x5e0] sm:$0xff]  ;;  %v78_v30 = vld [vmem:[#allocation5 + $0x90] sm:$0xff] }
  0x62   :  { %v244_v0 = vld [vmem:[#allocation5 + $0x620] sm:$0xff]  ;;  %v82_v31 = vld [vmem:[#allocation5 + $0xd0] sm:$0xff] }
  0x63   :  { %v246_v1 = vld [vmem:[#allocation5 + $0x660] sm:$0xff]  ;;  %v1029_v32 = vpack.c.bf16 %v82_v31, %v78_v30  ;;  %v158_v31 = vld [vmem:[#allocation5 + $0x590] sm:$0xff] }
  0x64   :  { %1018 = vmatpush1.bf16.msra.mxu1 %v1017_v39  ;;  %v235_v39 = vld [vmem:[#allocation5 + $0x4e8] sm:$0xff]  ;;  %v1137_v2 = vpack.c.bf16 %v246_v1, %v244_v0  ;;  %v248_v5 = vld [vmem:[#allocation5 + $0x6a0] sm:$0xff]  ;;  %v118_v1 = vld [vmem:[#allocation5 + $0x310] sm:$0xff] }
  0x65   :  { %1020 = vmatprep.subr.bf16.mxu1 %v1019_v41  ;;  %v1121_v41 = vpack.c.bf16 %v230_v37, %v228_v36  ;;  %v1123_v42 = vpack.c.bf16 %v235_v39, %v233_v38  ;;  %v250_v6 = vld [vmem:[#allocation5 + $0x6e0] sm:$0xff]  ;;  %v86_v37 = vld [vmem:[#allocation5 + $0x110] sm:$0xff] }
  0x66   :  { %v1141_v7 = vpack.c.bf16 %v250_v6, %v248_v5  ;;  %v252_v11 = vld [vmem:[#allocation5 + $0x720] sm:$0xff]  ;;  %v90_v38 = vld [vmem:[#allocation5 + $0x150] sm:$0xff] }
  0x67   :  { %v254_v12 = vld [vmem:[#allocation5 + $0x760] sm:$0xff]  ;;  %v1033_v39 = vpack.c.bf16 %v90_v38, %v86_v37  ;;  %v126_v6 = vld [vmem:[#allocation5 + $0x390] sm:$0xff] }
  0x68   :  { %1022 = vmatpush1.bf16.msra.mxu1 %v1021_v47  ;;  %v239_v47 = vld [vmem:[#allocation5 + $0x568] sm:$0xff]  ;;  %v1145_v13 = vpack.c.bf16 %v254_v12, %v252_v11  ;;  %v256_v19 = vld [vmem:[#allocation5 + $0x7a0] sm:$0xff]  ;;  %v134_v12 = vld [vmem:[#allocation5 + $0x410] sm:$0xff] }
  0x69   :  { %1088 = vmatprep.subr.bf16.mxu1 %v1087_v48  ;;  %v1125_v48 = vpack.c.bf16 %v234_v44, %v232_v43  ;;  %v1127_v49 = vpack.c.bf16 %v239_v47, %v237_v45  ;;  %v94_v43 = vld [vmem:[#allocation5 + $0x190] sm:$0xff]  ;;  %v103_v47 = vld [vmem:[#allocation5 + $0x218] sm:$0xff] }
  0x6a   :  { %v98_v45 = vld [vmem:[#allocation5 + $0x1d0] sm:$0xff] }
  0x6b   :  { %495 = vmatmul.mubr.f32.vlgmr.msra.gmra.mrb[0].mxu1 %v1413_v54  ;;  %v166_v38 = vld [vmem:[#allocation5 + $0x610] sm:$0xff] }
  0x6c   :  { %1090 = vmatpush1.bf16.msra.mxu1 %v1089_v55  ;;  %v243_v55 = vld [vmem:[#allocation5 + $0x5e8] sm:$0xff] }
  0x6d   :  { %1092 = vmatprep.subr.bf16.mxu1 %v1091_v56  ;;  %v1129_v56 = vpack.c.bf16 %v238_v52, %v236_v51  ;;  %v1131_v57 = vpack.c.bf16 %v243_v55, %v241_v53  ;;  %v102_v52 = vld [vmem:[#allocation5 + $0x210] sm:$0xff]  ;;  %v111_v55 = vld [vmem:[#allocation5 + $0x298] sm:$0xff] }
  0x6e   :  { %v106_v53 = vld [vmem:[#allocation5 + $0x250] sm:$0xff] }
  0x70   :  { %1094 = vmatpush1.bf16.msra.mxu1 %v1093_v61  ;;  %v247_v61 = vld [vmem:[#allocation5 + $0x668] sm:$0xff] }
  0x71   :  { %1096 = vmatprep.subr.bf16.mxu1 %v1095_v62  ;;  %v1133_v62 = vpack.c.bf16 %v242_v59, %v240_v58  ;;  %v1135_v63 = vpack.c.bf16 %v247_v61, %v245_v60  ;;  %v110_v59 = vld [vmem:[#allocation5 + $0x290] sm:$0xff]  ;;  %v119_v61 = vld [vmem:[#allocation5 + $0x318] sm:$0xff] }
  0x72   :  { %v114_v60 = vld [vmem:[#allocation5 + $0x2d0] sm:$0xff] }
  0x74   :  { %1098 = vmatpush1.bf16.msra.mxu1 %v1097_v50  ;;  %v249_v50 = vld [vmem:[#allocation5 + $0x6a8] sm:$0xff] }
  0x75   :  { %1100 = vmatprep.subr.bf16.mxu1 %v1099_v3  ;;  %v251_v3 = vld [vmem:[#allocation5 + $0x6e8] sm:$0xff] }
  0x76   :  { %v1139_v4 = vpack.c.bf16 %v251_v3, %v249_v50  ;;  %v127_v50 = vld [vmem:[#allocation5 + $0x398] sm:$0xff] }
  0x77   :  { %v131_v3 = vld [vmem:[#allocation5 + $0x3d8] sm:$0xff] }
  0x78   :  { %1102 = vmatpush1.bf16.msra.mxu1 %v1101_v8  ;;  %v253_v8 = vld [vmem:[#allocation5 + $0x728] sm:$0xff]  ;;  %v1051_v5 = vpack.c.bf16 %v131_v3, %v127_v50  ;;  %v952_v50 = vld [vmem:[%s1483_s3 + $0x10] ss:$8 sm:$0x3] }
  0x79   :  { %1104 = vmatprep.subr.bf16.mxu1 %v1103_v9  ;;  %v255_v9 = vld [vmem:[#allocation5 + $0x768] sm:$0xff]  ;;  %v953_v3 = vld [vmem:[%s1483_s3 + $0x11] ss:$8 sm:$0x3] }
  0x7a   :  { %v1143_v10 = vpack.c.bf16 %v255_v9, %v253_v8  ;;  %v135_v8 = vld [vmem:[#allocation5 + $0x418] sm:$0xff] }
  0x7b   :  { %v139_v9 = vld [vmem:[#allocation5 + $0x458] sm:$0xff] }
  0x7c   :  { %1106 = vmatpush1.bf16.msra.mxu1 %v1105_v14  ;;  %v257_v14 = vld [vmem:[#allocation5 + $0x7a8] sm:$0xff]  ;;  %v1055_v11 = vpack.c.bf16 %v139_v9, %v135_v8 }
  0x7d   :  { %1108 = vmatprep.subr.bf16.mxu1 %v1107_v15  ;;  %v259_v15 = vld [vmem:[#allocation5 + $0x7e8] sm:$0xff] }
  0x7e   :  { %v1147_v16 = vpack.c.bf16 %v259_v15, %v257_v14  ;;  %v143_v14 = vld [vmem:[#allocation5 + $0x498] sm:$0xff] }
  0x7f   :  { %v147_v15 = vld [vmem:[#allocation5 + $0x4d8] sm:$0xff] }
  0x80   :  { %1110 = vmatpush1.bf16.msra.mxu1 %v1109_v20  ;;  %v1023_v20 = vpack.c.bf16 %v75_v18, %v71_v17  ;;  %v1059_v17 = vpack.c.bf16 %v147_v15, %v143_v14  ;;  %v142_v18 = vld [vmem:[#allocation5 + $0x490] sm:$0xff] }
  0x81   :  { %1112 = vmatprep.subr.bf16.mxu1 %v1111_v21  ;;  %v258_v21 = vld [vmem:[#allocation5 + $0x7e0] sm:$0xff] }
  0x82   :  { %v1149_v24 = vpack.c.bf16 %v258_v21, %v256_v19  ;;  %1024 = vmatprep.subr.bf16.mxu0 %v1023_v20  ;;  %v146_v19 = vld [vmem:[#allocation5 + $0x4d0] sm:$0xff]  ;;  %v151_v20 = vld [vmem:[#allocation5 + $0x518] sm:$0xff] }
  0x83   :  { %1026 = vmatpush1.bf16.msra.mxu0 %v1025_v25  ;;  %v155_v21 = vld [vmem:[#allocation5 + $0x558] sm:$0xff]  ;;  %v1061_v22 = vpack.c.bf16 %v146_v19, %v142_v18  ;;  %v154_v25 = vld [vmem:[#allocation5 + $0x550] sm:$0xff] }
  0x84   :  { %1114 = vmatpush1.bf16.msra.mxu1 %v1113_v27  ;;  %v79_v27 = vld [vmem:[#allocation5 + $0x98] sm:$0xff]  ;;  %v1063_v23 = vpack.c.bf16 %v155_v21, %v151_v20 }
  0x85   :  { %1116 = vmatprep.subr.bf16.mxu1 %v1115_v28  ;;  %v83_v28 = vld [vmem:[#allocation5 + $0xd8] sm:$0xff] }
  0x86   :  { %v1027_v29 = vpack.c.bf16 %v83_v28, %v79_v27  ;;  %v159_v27 = vld [vmem:[#allocation5 + $0x598] sm:$0xff] }
  0x87   :  { %v163_v28 = vld [vmem:[#allocation5 + $0x5d8] sm:$0xff] }
  0x88   :  { %1118 = vmatpush1.bf16.msra.mxu1 %v1117_v34  ;;  %1028 = vmatprep.subr.bf16.mxu0 %v1027_v29  ;;  %v87_v34 = vld [vmem:[#allocation5 + $0x118] sm:$0xff]  ;;  %v1067_v30 = vpack.c.bf16 %v163_v28, %v159_v27 }
  0x89   :  { %1120 = vmatprep.subr.bf16.mxu1 %v1119_v35  ;;  %1030 = vmatpush1.bf16.msra.mxu0 %v1029_v32  ;;  %v91_v35 = vld [vmem:[#allocation5 + $0x158] sm:$0xff]  ;;  %v162_v32 = vld [vmem:[#allocation5 + $0x5d0] sm:$0xff] }
  0x8a   :  { %v1031_v36 = vpack.c.bf16 %v91_v35, %v87_v34  ;;  %v167_v34 = vld [vmem:[#allocation5 + $0x618] sm:$0xff] }
  0x8b   :  { %v171_v35 = vld [vmem:[#allocation5 + $0x658] sm:$0xff] }
  0x8c   :  { %1122 = vmatpush1.bf16.msra.mxu1 %v1121_v41  ;;  %v95_v41 = vld [vmem:[#allocation5 + $0x198] sm:$0xff]  ;;  %1032 = vmatprep.subr.bf16.mxu0 %v1031_v36  ;;  %v1069_v36 = vpack.c.bf16 %v162_v32, %v158_v31  ;;  %v1071_v37 = vpack.c.bf16 %v171_v35, %v167_v34  ;;  %v260_v34 = vld [vmem:[#allocation5 + $0x30] sm:$0xff] }
  0x8d   :  { %1124 = vmatprep.subr.bf16.mxu1 %v1123_v42  ;;  %v99_v42 = vld [vmem:[#allocation5 + $0x1d8] sm:$0xff]  ;;  %1034 = vmatpush1.bf16.msra.mxu0 %v1033_v39  ;;  %v170_v39 = vld [vmem:[#allocation5 + $0x650] sm:$0xff] }
  0x8e   :  { %v1035_v44 = vpack.c.bf16 %v99_v42, %v95_v41  ;;  %v175_v41 = vld [vmem:[#allocation5 + $0x698] sm:$0xff]  ;;  %v262_v35 = vld [vmem:[#allocation5 + $0x70] sm:$0xff] }
  0x8f   :  { %v179_v42 = vld [vmem:[#allocation5 + $0x6d8] sm:$0xff] }
  0x90   :  { %1126 = vmatpush1.bf16.msra.mxu1 %v1125_v48  ;;  %v107_v48 = vld [vmem:[#allocation5 + $0x258] sm:$0xff]  ;;  %1036 = vmatprep.subr.bf16.mxu0 %v1035_v44  ;;  %v1075_v44 = vpack.c.bf16 %v179_v42, %v175_v41  ;;  %v264_v41 = vld [vmem:[#allocation5 + $0xb0] sm:$0xff] }
  0x91   :  { %1128 = vmatprep.subr.bf16.mxu1 %v1127_v49  ;;  %v1037_v49 = vpack.c.bf16 %v98_v45, %v94_v43  ;;  %v1039_v51 = vpack.c.bf16 %v107_v48, %v103_v47  ;;  %v1073_v43 = vpack.c.bf16 %v170_v39, %v166_v38  ;;  %v174_v45 = vld [vmem:[#allocation5 + $0x690] sm:$0xff]  ;;  %v183_v48 = vld [vmem:[#allocation5 + $0x718] sm:$0xff] }
  0x92   :  { %v178_v47 = vld [vmem:[#allocation5 + $0x6d0] sm:$0xff]  ;;  %v263_v31 = vld [vmem:[#allocation5 + $0x78] sm:$0xff] }
  0x93   :  { %1038 = vmatpush1.bf16.msra.mxu0 %v1037_v49  ;;  %v187_v49 = vld [vmem:[#allocation5 + $0x758] sm:$0xff]  ;;  %v266_v42 = vld [vmem:[#allocation5 + $0xf0] sm:$0xff] }
  0x94   :  { %1130 = vmatpush1.bf16.msra.mxu1 %v1129_v56  ;;  %v115_v56 = vld [vmem:[#allocation5 + $0x2d8] sm:$0xff]  ;;  %1040 = vmatprep.subr.bf16.mxu0 %v1039_v51  ;;  %v1077_v51 = vpack.c.bf16 %v178_v47, %v174_v45 }
  0x95   :  { %1132 = vmatprep.subr.bf16.mxu1 %v1131_v57  ;;  %v1041_v57 = vpack.c.bf16 %v106_v53, %v102_v52  ;;  %v1043_v58 = vpack.c.bf16 %v115_v56, %v111_v55  ;;  %v1079_v52 = vpack.c.bf16 %v187_v49, %v183_v48  ;;  %v182_v53 = vld [vmem:[#allocation5 + $0x710] sm:$0xff]  ;;  %v191_v56 = vld [vmem:[#allocation5 + $0x798] sm:$0xff] }
  0x96   :  { %v186_v55 = vld [vmem:[#allocation5 + $0x750] sm:$0xff]  ;;  %v267_v38 = vld [vmem:[#allocation5 + $0xf8] sm:$0xff] }
  0x97   :  { %1042 = vmatpush1.bf16.msra.mxu0 %v1041_v57  ;;  %v195_v57 = vld [vmem:[#allocation5 + $0x7d8] sm:$0xff]  ;;  %v268_v48 = vld [vmem:[#allocation5 + $0x130] sm:$0xff] }
  0x98   :  { %1134 = vmatpush1.bf16.msra.mxu1 %v1133_v62  ;;  %v123_v62 = vld [vmem:[#allocation5 + $0x358] sm:$0xff]  ;;  %1044 = vmatprep.subr.bf16.mxu0 %v1043_v58  ;;  %v1081_v58 = vpack.c.bf16 %v186_v55, %v182_v53  ;;  %v270_v49 = vld [vmem:[#allocation5 + $0x170] sm:$0xff] }
  0x99   :  { %1136 = vmatprep.subr.bf16.mxu1 %v1135_v63  ;;  %v1045_v63 = vpack.c.bf16 %v114_v60, %v110_v59  ;;  %v1047_v0 = vpack.c.bf16 %v123_v62, %v119_v61  ;;  %v1083_v59 = vpack.c.bf16 %v195_v57, %v191_v56  ;;  %v190_v60 = vld [vmem:[#allocation5 + $0x790] sm:$0xff]  ;;  %v271_v45 = vld [vmem:[#allocation5 + $0x178] sm:$0xff] }
  0x9a   :  { %v194_v61 = vld [vmem:[#allocation5 + $0x7d0] sm:$0xff]  ;;  %v275_v53 = vld [vmem:[#allocation5 + $0x1f8] sm:$0xff] }
  0x9b   :  { %1046 = vmatpush1.bf16.msra.mxu0 %v1045_v63  ;;  %v1085_v62 = vpack.c.bf16 %v194_v61, %v190_v60  ;;  %v272_v56 = vld [vmem:[#allocation5 + $0x1b0] sm:$0xff]  ;;  %v279_v60 = vld [vmem:[#allocation5 + $0x278] sm:$0xff] }
  0x9c   :  { %1138 = vmatpush1.bf16.msra.mxu1 %v1137_v2  ;;  %v122_v2 = vld [vmem:[#allocation5 + $0x350] sm:$0xff]  ;;  %1048 = vmatprep.subr.bf16.mxu0 %v1047_v0 }
  0x9d   :  { %1140 = vmatprep.subr.bf16.mxu1 %v1139_v4  ;;  %v1049_v4 = vpack.c.bf16 %v122_v2, %v118_v1  ;;  %v274_v57 = vld [vmem:[#allocation5 + $0x1f0] sm:$0xff] }
  0x9f   :  { %1050 = vmatpush1.bf16.msra.mxu0 %v1049_v4  ;;  %v328_v4 = vrot.slane %v952_v50, %v1409_v46 }
  0xa0   :  { %1142 = vmatpush1.bf16.msra.mxu1 %v1141_v7  ;;  %v130_v7 = vld [vmem:[#allocation5 + $0x3d0] sm:$0xff]  ;;  %1052 = vmatprep.subr.bf16.mxu0 %v1051_v5  ;;  %v576_v5 = vrot.slane %v953_v3, %v1409_v46 }
  0xa1   :  { %1144 = vmatprep.subr.bf16.mxu1 %v1143_v10  ;;  %v1053_v10 = vpack.c.bf16 %v130_v7, %v126_v6  ;;  %v332_v6 = vrot.slane %v952_v50, %v1384_v40 }
  0xa3   :  { %1054 = vmatpush1.bf16.msra.mxu0 %v1053_v10 }
  0xa4   :  { %1146 = vmatpush1.bf16.msra.mxu1 %v1145_v13  ;;  %v138_v13 = vld [vmem:[#allocation5 + $0x450] sm:$0xff]  ;;  %1056 = vmatprep.subr.bf16.mxu0 %v1055_v11 }
  0xa5   :  { %1148 = vmatprep.subr.bf16.mxu1 %v1147_v16  ;;  %v1057_v16 = vpack.c.bf16 %v138_v13, %v134_v12 }
  0xa7   :  { %1058 = vmatpush1.bf16.msra.mxu0 %v1057_v16 }
  0xa8   :  { %1150 = vmatpush1.bf16.msra.mxu1 %v1149_v24  ;;  %1060 = vmatprep.subr.bf16.mxu0 %v1059_v17  ;;  %v150_v24 = vld [vmem:[#allocation5 + $0x510] sm:$0xff] }
  0xa9   :  { %v1065_v29 = vpack.c.bf16 %v154_v25, %v150_v24 }
  0xab   :  { %1062 = vmatpush1.bf16.msra.mxu0 %v1061_v22 }
  0xac   :  { %1064 = vmatprep.subr.bf16.mxu0 %v1063_v23 }
  0xaf   :  { %1066 = vmatpush1.bf16.msra.mxu0 %v1065_v29 }
  0xb0   :  { %1068 = vmatprep.subr.bf16.mxu0 %v1067_v30  ;;  %v261_v30 = vld [vmem:[#allocation5 + $0x38] sm:$0xff] }
  0xb1   :  { %v1151_v32 = vpack.c.bf16 %v263_v31, %v261_v30  ;;  %v296_v30 = vld [vmem:[#allocation5 + $0x4b0] sm:$0xff] }
  0xb3   :  { %1070 = vmatpush1.bf16.msra.mxu0 %v1069_v36  ;;  %v1153_v36 = vpack.c.bf16 %v262_v35, %v260_v34  ;;  %v301_v34 = vld [vmem:[#allocation5 + $0x538] sm:$0xff] }
  0xb4   :  { %1072 = vmatprep.subr.bf16.mxu0 %v1071_v37  ;;  %v265_v37 = vld [vmem:[#allocation5 + $0xb8] sm:$0xff] }
  0xb5   :  { %v1155_v39 = vpack.c.bf16 %v267_v38, %v265_v37  ;;  %v303_v35 = vld [vmem:[#allocation5 + $0x578] sm:$0xff]  ;;  %v300_v38 = vld [vmem:[#allocation5 + $0x530] sm:$0xff] }
  0xb6   :  { %v1191_v37 = vpack.c.bf16 %v303_v35, %v301_v34 }
  0xb7   :  { %1074 = vmatpush1.bf16.msra.mxu0 %v1073_v43  ;;  %v1157_v43 = vpack.c.bf16 %v266_v42, %v264_v41  ;;  %v305_v41 = vld [vmem:[#allocation5 + $0x5b8] sm:$0xff] }
  0xb8   :  { %1076 = vmatprep.subr.bf16.mxu0 %v1075_v44  ;;  %v269_v44 = vld [vmem:[#allocation5 + $0x138] sm:$0xff] }
  0xb9   :  { %v1159_v47 = vpack.c.bf16 %v271_v45, %v269_v44  ;;  %v307_v42 = vld [vmem:[#allocation5 + $0x5f8] sm:$0xff]  ;;  %v304_v45 = vld [vmem:[#allocation5 + $0x5b0] sm:$0xff] }
  0xba   :  { %v1195_v44 = vpack.c.bf16 %v307_v42, %v305_v41 }
  0xbb   :  { %1078 = vmatpush1.bf16.msra.mxu0 %v1077_v51  ;;  %v1161_v51 = vpack.c.bf16 %v270_v49, %v268_v48  ;;  %v309_v48 = vld [vmem:[#allocation5 + $0x638] sm:$0xff] }
  0xbc   :  { %1080 = vmatprep.subr.bf16.mxu0 %v1079_v52  ;;  %v273_v52 = vld [vmem:[#allocation5 + $0x1b8] sm:$0xff] }
  0xbd   :  { %v1163_v55 = vpack.c.bf16 %v275_v53, %v273_v52  ;;  %v311_v49 = vld [vmem:[#allocation5 + $0x678] sm:$0xff]  ;;  %v308_v53 = vld [vmem:[#allocation5 + $0x630] sm:$0xff] }
  0xbe   :  { %v1199_v52 = vpack.c.bf16 %v311_v49, %v309_v48 }
  0xbf   :  { %1082 = vmatpush1.bf16.msra.mxu0 %v1081_v58  ;;  %v1165_v58 = vpack.c.bf16 %v274_v57, %v272_v56 }
  0xc0   :  { %1084 = vmatprep.subr.bf16.mxu0 %v1083_v59  ;;  %v277_v59 = vld [vmem:[#allocation5 + $0x238] sm:$0xff] }
  0xc1   :  { %v1167_v61 = vpack.c.bf16 %v279_v60, %v277_v59  ;;  %v315_v59 = vld [vmem:[#allocation5 + $0x6f8] sm:$0xff] }
  0xc3   :  { %1086 = vmatpush1.bf16.msra.mxu0 %v1085_v62  ;;  %v276_v62 = vld [vmem:[#allocation5 + $0x230] sm:$0xff] }
  0xc4   :  { %1152 = vmatprep.subr.bf16.mxu0 %v1151_v32  ;;  %v298_v32 = vld [vmem:[#allocation5 + $0x4f0] sm:$0xff] }
  0xc6   :  { %566 = vmatmul.mubr.f32.vlgmr.msra.gmra.mrb[4].mxu0 %v1413_v54  ;;  %v580_v54 = vrot.slane %v953_v3, %v1384_v40  ;;  %v280_v3 = vld [vmem:[#allocation5 + $0x2b0] sm:$0xff] }
  0xc7   :  { %1154 = vmatpush1.bf16.msra.mxu0 %v1153_v36  ;;  %v1189_v36 = vpack.c.bf16 %v298_v32, %v296_v30 }
  0xc8   :  { %1156 = vmatprep.subr.bf16.mxu0 %v1155_v39  ;;  %v302_v39 = vld [vmem:[#allocation5 + $0x570] sm:$0xff] }
  0xcb   :  { %1158 = vmatpush1.bf16.msra.mxu0 %v1157_v43  ;;  %v1193_v43 = vpack.c.bf16 %v302_v39, %v300_v38 }
  0xcc   :  { %1160 = vmatprep.subr.bf16.mxu0 %v1159_v47  ;;  %v306_v47 = vld [vmem:[#allocation5 + $0x5f0] sm:$0xff] }
  0xcf   :  { %1162 = vmatpush1.bf16.msra.mxu0 %v1161_v51  ;;  %v1197_v51 = vpack.c.bf16 %v306_v47, %v304_v45 }
  0xd0   :  { %1164 = vmatprep.subr.bf16.mxu0 %v1163_v55  ;;  %v310_v55 = vld [vmem:[#allocation5 + $0x670] sm:$0xff] }
  0xd1   :  { %v1201_v56 = vpack.c.bf16 %v310_v55, %v308_v53 }
  0xd3   :  { %1166 = vmatpush1.bf16.msra.mxu0 %v1165_v58  ;;  %v313_v58 = vld [vmem:[#allocation5 + $0x6b8] sm:$0xff] }
  0xd4   :  { %1168 = vmatprep.subr.bf16.mxu0 %v1167_v61  ;;  %v1203_v60 = vpack.c.bf16 %v315_v59, %v313_v58  ;;  %v312_v61 = vld [vmem:[#allocation5 + $0x6b0] sm:$0xff] }
 0x10b   :  { %v408_v63 = vpop.f32.mrb[0].mxu0 }
 0x10c   :  { %v410_v0 = vpop.f32.mrb[1].mxu0  ;;  %v1427_v8 = vadd.f32 %v408_v63, %v328_v4  ;;  %v278_v63 = vld [vmem:[#allocation5 + $0x270] sm:$0xff] }
 0x10d   :  { %v1429_v11 = vadd.f32 %v410_v0, %v332_v6  ;;  %v1169_v0 = vpack.c.bf16 %v278_v63, %v276_v62  ;;  %v314_v62 = vld [vmem:[#allocation5 + $0x6f0] sm:$0xff] }
 0x10e   :  { %v1205_v63 = vpack.c.bf16 %v314_v62, %v312_v61 }
 0x10f   :  { %v414_v1 = vpop.f32.mrb[2].mxu0  ;;  %1170 = vmatpush1.bf16.msra.mxu0 %v1169_v0 }
 0x110   :  { %v416_v2 = vpop.f32.mrb[3].mxu0  ;;  %v1434_v15 = vadd.f32 %v414_v1, %v328_v4  ;;  %v281_v1 = vld [vmem:[#allocation5 + $0x2b8] sm:$0xff]  ;;  %v282_v4 = vld [vmem:[#allocation5 + $0x2f0] sm:$0xff] }
 0x111   :  { %v1431_v13 = vadd.f32 %v416_v2, %v332_v6  ;;  %v283_v2 = vld [vmem:[#allocation5 + $0x2f8] sm:$0xff] }
 0x112   :  { %v1171_v50 = vpack.c.bf16 %v283_v2, %v281_v1  ;;  %v285_v6 = vld [vmem:[#allocation5 + $0x338] sm:$0xff] }
 0x113   :  { %v317_v1 = vld [vmem:[#allocation5 + $0x738] sm:$0xff] }
 0x114   :  { %1172 = vmatprep.subr.bf16.mxu0 %v1171_v50  ;;  %v319_v2 = vld [vmem:[#allocation5 + $0x778] sm:$0xff] }
 0x115   :  { %v1207_v50 = vpack.c.bf16 %v319_v2, %v317_v1 }
 0x13e   :  { %v496_v7 = vpop.f32.mrb[0].mxu1 }
 0x13f   :  { %v583_v9 = vadd.f32 %v576_v5, %v496_v7  ;;  %v498_v10 = vpop.f32.mrb[1].mxu1  ;;  %v1173_v5 = vpack.c.bf16 %v282_v4, %v280_v3  ;;  %v316_v3 = vld [vmem:[#allocation5 + $0x730] sm:$0xff] }
 0x140   :  { %v584_v12 = vadd.f32 %v580_v54, %v498_v10  ;;  %v287_v54 = vld [vmem:[#allocation5 + $0x378] sm:$0xff]  ;;  %v286_v10 = vld [vmem:[#allocation5 + $0x370] sm:$0xff] }
 0x141   :  { %v588_v14 = vrot.slane %v583_v9, %v1409_v46  ;;  %1174 = vmatpush1.bf16.msra.mxu0 %v1173_v5  ;;  %v1175_v7 = vpack.c.bf16 %v287_v54, %v285_v6  ;;  %v284_v9 = vld [vmem:[#allocation5 + $0x330] sm:$0xff]  ;;  %v321_v6 = vld [vmem:[#allocation5 + $0x7b8] sm:$0xff] }
 0x142   :  { %v592_v16 = vrot.slane %v584_v12, %v1409_v46  ;;  %v1177_v12 = vpack.c.bf16 %v286_v10, %v284_v9  ;;  %v318_v4 = vld [vmem:[#allocation5 + $0x770] sm:$0xff]  ;;  %v323_v54 = vld [vmem:[#allocation5 + $0x7f8] sm:$0xff] }
 0x143   :  { %v593_v17 = vadd.f32 %v588_v14, %v1427_v8  ;;  %v595_v20 = vadd.f32 %v588_v14, %v1434_v15  ;;  %1176 = vmatprep.subr.bf16.mxu0 %v1175_v7  ;;  %v289_v14 = vld [vmem:[#allocation5 + $0x3b8] sm:$0xff]  ;;  %v1209_v5 = vpack.c.bf16 %v318_v4, %v316_v3  ;;  %v1211_v7 = vpack.c.bf16 %v323_v54, %v321_v6  ;;  %v320_v9 = vld [vmem:[#allocation5 + $0x7b0] sm:$0xff] }
 0x144   :  { %v594_v18 = vadd.f32 %v592_v16, %v1429_v11  ;;  %v596_v19 = vadd.f32 %v592_v16, %v1431_v13  ;;  %v291_v16 = vld [vmem:[#allocation5 + $0x3f8] sm:$0xff]  ;;  %v322_v10 = vld [vmem:[#allocation5 + $0x7f0] sm:$0xff] }
 0x145   :  { %v601_v21 = vmul.f32 0.2, %v593_v17  ;;  %vm597_vm2 = vcmp.gt.f32.partialorder %v593_v17, 0.0  ;;  %v603_v27 = vmul.f32 0.2, %v595_v20  ;;  %vm599_vm4 = vcmp.gt.f32.partialorder %v595_v20, 0.0  ;;  %1178 = vmatpush1.bf16.msra.mxu0 %v1177_v12 }
 0x146   :  { %vm598_vm1 = vcmp.gt.f32.partialorder %v594_v18, 0.0  ;;  %v602_v22 = vmul.f32 0.2, %v594_v18  ;;  %v604_v23 = vmul.f32 0.2, %v596_v19  ;;  %vm600_vm3 = vcmp.gt.f32.partialorder %v596_v19, 0.0 }
 0x147   :  { %v605_v25 = vsel %vm597_vm2, %v593_v17, %v601_v21  ;;  %v607_v29 = vsel %vm599_vm4, %v595_v20, %v603_v27  ;;  %v1179_v17 = vpack.c.bf16 %v291_v16, %v289_v14  ;;  %v293_v21 = vld [vmem:[#allocation5 + $0x438] sm:$0xff]  ;;  %v1213_v12 = vpack.c.bf16 %v322_v10, %v320_v9 }
 0x148   :  { %v606_v24 = vsel %vm598_vm1, %v594_v18, %v602_v22  ;;  %v608_v28 = vsel %vm600_vm3, %v596_v19, %v604_v23  ;;  %v288_v18 = vld [vmem:[#allocation5 + $0x3b0] sm:$0xff]  ;;  %v295_v22 = vld [vmem:[#allocation5 + $0x478] sm:$0xff] }
 0x149   :  { %673 = vmatprep.mubr.f32.mxu1 %v606_v24  ;;  %v290_v19 = vld [vmem:[#allocation5 + $0x3f0] sm:$0xff]  ;;  %1180 = vmatprep.subr.bf16.mxu0 %v1179_v17  ;;  %v1183_v23 = vpack.c.bf16 %v295_v22, %v293_v21  ;;  %v52_v17 = vld [vmem:[#allocation2] sm:$0xff] }
 0x14a   :  { %674 = vmatmul.mubr.f32.vlgmr.msra.gmra.mrb[2].mxu1 %v605_v25  ;;  %v1181_v20 = vpack.c.bf16 %v290_v19, %v288_v18  ;;  %v292_v24 = vld [vmem:[#allocation5 + $0x430] sm:$0xff]  ;;  %v53_v19 = vld [vmem:[#allocation2 + $0x8] sm:$0xff] }
 0x14b   :  { %679 = vmatprep.mubr.f32.mxu1 %v608_v28  ;;  %v294_v25 = vld [vmem:[#allocation5 + $0x470] sm:$0xff]  ;;  %v297_v28 = vld [vmem:[#allocation5 + $0x4b8] sm:$0xff] }
 0x14c   :  { %1182 = vmatpush1.bf16.msra.mxu0 %v1181_v20  ;;  %v1185_v27 = vpack.c.bf16 %v294_v25, %v292_v24  ;;  %v54_v18 = vld [vmem:[#allocation2 + $0x10] sm:$0xff]  ;;  %v55_v20 = vld [vmem:[#allocation2 + $0x18] sm:$0xff] }
 0x14d   :  { %1184 = vmatprep.subr.bf16.mxu0 %v1183_v23 }
 0x14e   :  { %680 = vmatmul.mubr.f32.gmra.mrb[4].mxu1 %v607_v29  ;;  %v299_v29 = vld [vmem:[#allocation5 + $0x4f8] sm:$0xff] }
 0x14f   :  { %v1187_v31 = vpack.c.bf16 %v299_v29, %v297_v28 }
 0x150   :  { %1186 = vmatpush1.bf16.msra.mxu0 %v1185_v27 }
 0x151   :  { %1188 = vmatprep.subr.bf16.mxu0 %v1187_v31 }
 0x154   :  { %1190 = vmatpush1.bf16.msra.mxu0 %v1189_v36 }
 0x155   :  { %1192 = vmatprep.subr.bf16.mxu0 %v1191_v37 }
 0x158   :  { %1194 = vmatpush1.bf16.msra.mxu0 %v1193_v43 }
 0x159   :  { %1196 = vmatprep.subr.bf16.mxu0 %v1195_v44 }
 0x15c   :  { %1198 = vmatpush1.bf16.msra.mxu0 %v1197_v51 }
 0x15d   :  { %1200 = vmatprep.subr.bf16.mxu0 %v1199_v52 }
 0x160   :  { %1202 = vmatpush1.bf16.msra.mxu0 %v1201_v56 }
 0x161   :  { %1204 = vmatprep.subr.bf16.mxu0 %v1203_v60 }
 0x164   :  { %1206 = vmatpush1.bf16.msra.mxu0 %v1205_v63 }
 0x165   :  { %1208 = vmatprep.subr.bf16.mxu0 %v1207_v50 }
 0x168   :  { %1210 = vmatpush1.bf16.msra.mxu0 %v1209_v5 }
 0x169   :  { %1212 = vmatprep.subr.bf16.mxu0 %v1211_v7 }
 0x16c   :  { %1214 = vmatpush1.bf16.msra.mxu0 %v1213_v12 }
 0x199   :  { %v1441_v57 = vpop.f32.mrb[4].mxu0 }
 0x19a   :  { %v1443_v0 = vpop.f32.mrb[5].mxu0 }
 0x21d   :  { %v675_v14 = vpop.f32.mrb[2].mxu1 }
 0x21e   :  { %v677_v16 = vpop.f32.mrb[3].mxu1  ;;  %v676_v22 = vadd.f32 %v675_v14, %v52_v17 }
 0x21f   :  { %v678_v25 = vadd.f32 %v677_v16, %v53_v19 }
 0x221   :  { %v681_v21 = vpop.f32.mrb[4].mxu1 }
 0x222   :  { %v682_v23 = vadd.f32 %v681_v21, %v54_v18  ;;  %v683_v24 = vpop.f32.mrb[5].mxu1 }
 0x223   :  { %v684_v27 = vadd.f32 %v683_v24, %v55_v20 }
 0x224   :  { %v686_v28 = vmax.f32 %v676_v22, %v682_v23 }
 0x225   :  { %v693_v29 = vmax.f32 %v678_v25, %v684_v27 }
 0x226   :  { %v687_v30 = vrot.slane %v686_v28, 4 }
 0x227   :  { %v694_v31 = vrot.slane %v693_v29, 4 }
 0x228   :  { %v688_v32 = vmax.f32 %v686_v28, %v687_v30 }
 0x229   :  { %v695_v34 = vmax.f32 %v693_v29, %v694_v31 }
 0x22a   :  { %v689_v35 = vrot.slane %v688_v32, 2 }
 0x22b   :  { %v696_v36 = vrot.slane %v695_v34, 2 }
 0x22c   :  { %v690_v37 = vmax.f32 %v688_v32, %v689_v35 }
 0x22d   :  { %v697_v38 = vmax.f32 %v695_v34, %v696_v36 }
 0x22e   :  { %v691_v39 = vrot.slane %v690_v37, 1 }
 0x22f   :  { %v698_v41 = vrot.slane %v697_v38, 1 }
 0x230   :  { %v692_v42 = vmax.f32 %v690_v37, %v691_v39 }
 0x231   :  { %v699_v43 = vmax.f32 %v697_v38, %v698_v41 }
 0x232   :  { %v700_v44 = vsub.f32 %v676_v22, %v692_v42  ;;  %v702_v45 = vsub.f32 %v682_v23, %v692_v42 }
 0x233   :  { %v701_v47 = vsub.f32 %v678_v25, %v699_v43  ;;  %v703_v48 = vsub.f32 %v684_v27, %v699_v43  ;;  %v954_v25 = vld [vmem:[%s1483_s3 + $0x12] ss:$8 sm:$0x3] }
 0x234   :  { %v704_v49 = vmul.f32 1.442695, %v700_v44  ;;  %v708_v51 = vmul.f32 1.442695, %v702_v45  ;;  %v754_v30 = vrot.slane %v954_v25, %v1409_v46  ;;  %v758_v36 = vrot.slane %v954_v25, %v1384_v40 }
 0x235   :  { %v706_v52 = vmul.f32 1.442695, %v701_v47  ;;  %v710_v53 = vmul.f32 1.442695, %v703_v48 }
 0x236   :  { %1224 = vpow2.f32 %v704_v49 }
 0x237   :  { %1226 = vpow2.f32 %v708_v51 }
 0x238   :  { %1228 = vpow2.f32 %v706_v52 }
 0x239   :  { %1230 = vpow2.f32 %v710_v53 }
 0x240   :  { %v1225_v55 = vpop.eup %1224 }
 0x241   :  { %v1227_v56 = vpop.eup %1226  ;;  %v726_v58 = vmul.f32 %v1225_v55, %v1427_v8 }
 0x242   :  { %v1229_v59 = vpop.eup %1228  ;;  %v712_v60 = vadd.f32 %v1227_v56, %v1225_v55  ;;  %v728_v61 = vmul.f32 %v1227_v56, %v1434_v15 }
 0x243   :  { %v1231_v62 = vpop.eup %1230  ;;  %v727_v63 = vmul.f32 %v1229_v59, %v1429_v11 }
 0x244   :  { %v713_v1 = vrot.slane %v712_v60, 4  ;;  %v719_v2 = vadd.f32 %v1231_v62, %v1229_v59  ;;  %v730_v50 = vadd.f32 %v728_v61, %v726_v58  ;;  %v729_v3 = vmul.f32 %v1231_v62, %v1431_v13  ;;  %v955_v59 = vld [vmem:[%s1483_s3 + $0x13] ss:$8 sm:$0x3] }
 0x245   :  { %v956_v61 = vld [vmem:[%s1483_s3 + $0x14] ss:$8 sm:$0x3]  ;;  %s1324_s3 = smov [#allocation7]  }
 0x246   :  { %v714_v4 = vadd.f32 %v713_v1, %v712_v60  ;;  %v720_v5 = vrot.slane %v719_v2, 4  ;;  %v731_v6 = vrot.slane %v730_v50, 4  ;;  %v737_v54 = vadd.f32 %v729_v3, %v727_v63  ;;  %s942_s12 = sshll.u32 %s1324_s3, 4  ;;  %s943_s12 = int_to_ptr.vmem [resolvable:$true] %s942_s12 }
 0x247   :  { %s1288_s13 = scalar_lea.vmem %s943_s12, 32  ;;  %p1293_p3 = scmp.lt.s32.totalorder %s943_s12, %s943_s12 }
 0x248   :  { %v721_v7 = vadd.f32 %v720_v5, %v719_v2  ;;  %v715_v9 = vrot.slane %v714_v4, 2  ;;  %v738_v10 = vrot.slane %v737_v54, 4  ;;  %v732_v8 = vadd.f32 %v731_v6, %v730_v50  ;;  %p1289_p2 = scmp.ne.s32.totalorder %s943_s12, %s1288_s13  ;;  %p1294_p4 = scmp.lt.s32.totalorder %s1288_s13, %s1288_s13 }
 0x249   :  { %v873_v2 = vrot.slane %v955_v59, %v1409_v46  ;;  %v886_v6 = vrot.slane %v956_v61, %v1409_v46  ;;  %v1323_v46 = vmov 1966171168  }
 0x24a   :  { %v716_v12 = vadd.f32 %v715_v9, %v714_v4  ;;  %v722_v14 = vrot.slane %v721_v7, 2  ;;  %v739_v16 = vadd.f32 %v738_v10, %v737_v54  ;;  %v733_v18 = vrot.slane %v732_v8, 2  ;;  %p1295_p5 = por %p1294_p4, %p1293_p3 }
 0x24b   :  { %v877_v4 = vrot.slane %v955_v59, %v1384_v40 }
 0x24c   :  { %v717_v15 = vrot.slane %v716_v12, 1  ;;  %v723_v17 = vadd.f32 %v722_v14, %v721_v7  ;;  %v740_v20 = vrot.slane %v739_v16, 2  ;;  %v734_v13 = vadd.f32 %v733_v18, %v732_v8  ;;  %p1296_p6 = pnand %p1295_p5, %p1289_p2 }
 0x24d   :  { %v890_v7 = vrot.slane %v956_v61, %v1384_v40 }
 0x24e   :  { %v718_v11 = vadd.f32 %v717_v15, %v716_v12  ;;  %v724_v19 = vrot.slane %v723_v17, 1  ;;  %v741_v22 = vadd.f32 %v740_v20, %v739_v16  ;;  %v735_v23 = vrot.slane %v734_v13, 1 }
 0x250   :  { %1232 = vrcp.f32 %v718_v11  ;;  %v725_v21 = vadd.f32 %v724_v19, %v723_v17  ;;  %v742_v24 = vrot.slane %v741_v22, 1  ;;  %v736_v27 = vadd.f32 %v735_v23, %v734_v13 }
 0x252   :  { %1234 = vrcp.f32 %v725_v21  ;;  %v743_v31 = vadd.f32 %v742_v24, %v741_v22  ;;  %v917_v22 = vunpack.c.l.s4 %v1323_v46 }
 0x254   :  { %v918_v40 = vunpack.c.0.s8 %v917_v22 }
 0x25a   :  { %v1233_v28 = vpop.eup %1232 }
 0x25b   :  { %v746_v29 = vmul.f32 %v1233_v28, %v736_v27 }
 0x25c   :  { %v1235_v32 = vpop.eup %1234 }
 0x25d   :  { %v748_v34 = vadd.f32 %v746_v29, %v1441_v57  ;;  %v747_v35 = vmul.f32 %v1235_v32, %v743_v31  ;;  %v921_v32 = vsub.s32 %v918_v40, %v1381_v33 }
 0x25f   :  { %v761_v37 = vadd.f32 %v754_v30, %v748_v34  ;;  %v749_v38 = vadd.f32 %v747_v35, %v1443_v0 }
 0x261   :  { %v763_v39 = vmul.f32 %v761_v37, %v761_v37  ;;  %v762_v41 = vadd.f32 %v758_v36, %v749_v38 }
 0x263   :  { %v764_v42 = vmul.f32 %v762_v41, %v762_v41  ;;  %v767_v43 = vrot.slane %v763_v39, 7 }
 0x265   :  { %v768_v44 = vrot.slane %v764_v42, 7  ;;  %v772_v47 = vsel %vm771_vm5, %v761_v37, %v767_v43 }
 0x267   :  { %v773_v45 = vsel %vm771_vm5, %v762_v41, %v768_v44 }
 0x268   :  { %838 = vmatprep.mubr.f32.mxu0 %v773_v45 }
 0x269   :  { %839 = vmatmul.mubr.f32.vlgmr.msra.gmra.mrb[6].mxu0 %v772_v47 }
 0x33c   :  { %v840_v48 = vpop.f32.mrb[6].mxu0 }
 0x33d   :  { %v845_v49 = vmul.f32 %v840_v48, %v840_v48  ;;  %v842_v51 = vpop.f32.mrb[7].mxu0  ;;  %v855_v63 = vsub.f32 %v761_v37, %v840_v48 }
 0x33e   :  { %v846_v57 = vmul.f32 %v842_v51, %v842_v51  ;;  %v856_v50 = vsub.f32 %v762_v41, %v842_v51 }
 0x33f   :  { %v849_v52 = vrot.slane %v845_v49, 7 }
 0x340   :  { %v850_v53 = vrot.slane %v846_v57, 7 }
 0x341   :  { %v853_v55 = vsub.f32 %v840_v48, %v849_v52 }
 0x342   :  { %v854_v56 = vsub.f32 %v842_v51, %v850_v53 }
 0x343   :  { %v857_v58 = vadd.f32 1e-05, %v853_v55 }
 0x344   :  { %v858_v0 = vadd.f32 1e-05, %v854_v56 }
 0x345   :  { %1236 = vrsqrt.f32 %v857_v58 }
 0x346   :  { %1238 = vrsqrt.f32 %v858_v0 }
 0x34f   :  { %v1237_v60 = vpop.eup %1236 }
 0x350   :  { %v1239_v62 = vpop.eup %1238  ;;  %v863_v1 = vrot.slane %v1237_v60, 1 }
 0x351   :  { %v864_v3 = vrot.slane %v1239_v62, 1 }
 0x352   :  { %v867_v5 = vmul.f32 %v863_v1, %v855_v63 }
 0x353   :  { %v868_v54 = vmul.f32 %v864_v3, %v856_v50 }
 0x354   :  { %v880_v9 = vmul.f32 %v873_v2, %v867_v5 }
 0x355   :  { %v881_v10 = vmul.f32 %v877_v4, %v868_v54 }
 0x356   :  { %v893_v8 = vadd.f32 %v886_v6, %v880_v9 }
 0x357   :  { %v894_v12 = vadd.f32 %v890_v7, %v881_v10 }
 0x358   :  { %v895_v14 = vmul.f32 %v893_v8, %v893_v8  ;;  %v905_v25 = vmul.f32 0.5, %v893_v8 }
 0x359   :  { %v896_v16 = vmul.f32 %v894_v12, %v894_v12  ;;  %v906_v28 = vmul.f32 0.5, %v894_v12 }
 0x35a   :  { %v897_v15 = vmul.f32 %v895_v14, %v893_v8 }
 0x35b   :  { %v898_v17 = vmul.f32 %v896_v16, %v894_v12 }
 0x35c   :  { %v899_v18 = vmul.f32 0.044715, %v897_v15 }
 0x35d   :  { %v900_v11 = vmul.f32 0.044715, %v898_v17 }
 0x35e   :  { %v901_v19 = vadd.f32 %v899_v18, %v893_v8 }
 0x35f   :  { %v902_v20 = vadd.f32 %v900_v11, %v894_v12 }
 0x360   :  { %v903_v21 = vmul.f32 0.7978846, %v901_v19 }
 0x361   :  { %v904_v13 = vmul.f32 0.7978846, %v902_v20 }
 0x362   :  { %1240 = vtanh.f32 %v903_v21 }
 0x363   :  { %1242 = vtanh.f32 %v904_v13 }
 0x36c   :  { %v1241_v23 = vpop.eup %1240 }
 0x36d   :  { %v1243_v24 = vpop.eup %1242  ;;  %v909_v27 = vadd.f32 1.0, %v1241_v23 }
 0x36e   :  { %v910_v29 = vadd.f32 1.0, %v1243_v24 }
 0x36f   :  { %v911_v30 = vmul.f32 %v909_v27, %v905_v25 }
 0x370   :  { %v912_v31 = vmul.f32 %v910_v29, %v906_v28 }
 0x372   :  { %v915_v34 = vcombine.low %v911_v30, %v912_v31 }
 0x374   :  { %v922_v35 = vrot.slane %v915_v34, %v921_v32 }
 0x376   :  { %v929_v36 = vrot.slane %v922_v35, %v921_v32 }
 0x378   :  { %935 = vst.msk [vmem:[#allocation7] sm:$0x3] %vm933_vm6, %v929_v36 }
 0x379   :  { %1299 = shalt.err (!%p1296_p6)
}
 0x37a   :  { %s1300_s16 = scalar_lea.hbm %s1485_s5, 32 }
 0x37b   :  { %p1301_p7 = scmp.ne.s32.totalorder %s1485_s5, %s1300_s16  ;;  %p1304_p8 = scmp.lt.u32.totalorder %s1300_s16, %s1485_s5 }
 0x37d   :  { %p1306_p9 = pnand %p1304_p8, %p1301_p7 }
 0x37f   :  { %1309 = shalt.err (!%p1306_p9)
}
 0x380   :  { %945 = dma.vmem_to_hbm [thread:$0]  %s943_s12, 32, %s1485_s5, [#allocation4]  }
 0x381   :  { %1314 = dma.done.wait [#allocation4], 32  }
 0x382   :  { %1315 = vsyncadd [#allocation4], 4294967264 }
 0x383   :  { %949 = vsyncpa [#allocation3], 1 }
 0x384   :  { %950 = vsyncpa [#allocation6], 1 }
 0x385   :  { %951 = vsyncpa [#allocation4], 1 }

</bundles_post_ra>
